<compile_context>
chip_gen: v6e
topology: v6e:2x2x1
jax: 0.10.0
libtpu: 0.0.40
codegen_flags: <defaults>
</compile_context>

<pallas_src>
import jax
import jax.numpy as jnp
from jax.experimental import pallas as pl
from jax.experimental.pallas import tpu as pltpu


def _round_up(x, m):
    return ((x + m - 1) // m) * m


def _pick_tcout(coutp, k, l, hw):
    """Largest Cout tile (multiple of 8, divides coutp) whose working set fits a
    conservative VMEM budget.  Counts the double-buffered bf16 input slab, the two
    double-buffered bf16 weight halves, the double-buffered f32 output block and f32
    temporaries for the fused norm epilogue."""
    budget = 40 * 2 ** 20                    # headroom below v7x's 64 MiB / TC
    x_bytes = 2 * k * l * 2                  # input slab, bf16, double-buffered

    def estimate(tc):
        w_bytes = 2 * 2 * tc * k * 2         # two weight halves, bf16, double-buffered
        o_bytes = 2 * tc * hw * 4            # f32 output block, double-buffered
        t_bytes = 4 * tc * hw * 4            # y / centered / normalized temporaries
        return x_bytes + w_bytes + o_bytes + t_bytes

    best = 8
    for tc in (256, 128, 64, 32, 16, 8):
        if tc <= coutp and coutp % tc == 0 and estimate(tc) <= budget:
            best = tc
            break
    return best, estimate(best)


def _make_kernel(hw, wo, normalize):
    inv_hw = 1.0 / float(hw)

    def kernel(x_ref, w0_ref, w1_ref, o_ref):
        # x_ref : (K, (Ho+1)*Wo) bf16  -- column-resolved space-to-depth slab
        # w*_ref: (TCout, K)     bf16  -- kernel-row taps di=0 / di=1
        # o_ref : (TCout, HW)    f32
        x0 = x_ref[:, 0:hw]                  # rows ho + 0
        x1 = x_ref[:, wo:wo + hw]            # rows ho + 1 (static lane-offset view)
        # Conv as two accumulating MXU matmuls, f32 accumulation, lane dim = HW.
        y = jnp.dot(w0_ref[...], x0, preferred_element_type=jnp.float32)
        y = y + jnp.dot(w1_ref[...], x1, preferred_element_type=jnp.float32)

        if normalize:
            # Exact two-pass (centered) per-channel instance-norm statistics.
            mean = jnp.sum(y, axis=1, keepdims=True) * inv_hw     # (TCout, 1)
            yc = y - mean
            var = jnp.sum(yc * yc, axis=1, keepdims=True) * inv_hw
            yn = yc * jax.lax.rsqrt(var + 1e-5)                   # EUP rsqrt
        else:
            yn = y

        # LeakyReLU(0.2) as a single select-multiply (VPU).
        o_ref[...] = (yn * jnp.where(yn >= 0.0, 1.0, 0.2)).astype(o_ref.dtype)

    return kernel


def unet_down(x, weight, *, normalize=True, dropout=0.0):
    """x: (N, Cin, H, W) NCHW.  weight: (Cout, Cin, 4, 4) (PyTorch OIHW layout).
    Returns LeakyReLU_0.2(InstanceNorm(Conv2d_{k4,s2,p1,no-bias}(x))) as float32 NCHW."""
    assert dropout == 0.0, "dropout > 0 is not implemented in the Pallas kernel"
    N, Cin, H, W = x.shape
    Cout, cin_w, kh, kw = weight.shape
    assert (cin_w, kh, kw) == (Cin, 4, 4), "expected a (Cout, Cin, 4, 4) conv weight"
    assert H % 2 == 0 and W % 2 == 0
    Ho, Wo = H // 2, W // 2
    HW = Ho * Wo
    K = 8 * Cin                      # (dj, pj, pi, c) taps
    L = (Ho + 1) * Wo                # flattened (row, col) incl. one halo row

    # ---- wrapper-side space-to-depth in bf16 (~2x footprint; replaces 4x f32 im2col) --
    xb = x.astype(jnp.bfloat16)
    xp = jnp.pad(xb, ((0, 0), (0, 0), (1, 1), (1, 1)))            # (N, C, H+2, W+2)
    ph = xp.reshape(N, Cin, Ho + 1, 2, Wo + 1, 2)                 # [n, c, a, pi, b, pj]
    cols = jnp.stack([ph[:, :, :, :, :Wo, :],                     # column shift dj = 0
                      ph[:, :, :, :, 1:, :]], axis=1)             # column shift dj = 1
    # cols: [n, dj, c, a, pi, wo, pj] -> [n, dj, pj, pi, c, a, wo]
    xflat = cols.transpose(0, 1, 6, 4, 2, 3, 5).reshape(N, K, L)  # k=((dj*2+pj)*2+pi)*C+c

    # ---- weight (Cout, Cin, 4, 4) -> two (Coutp, K) matrices (kernel-row di = 0 / 1) --
    w6 = weight.reshape(Cout, Cin, 2, 2, 2, 2)                    # [co, c, di, pi, dj, pj]
    wr = w6.transpose(2, 0, 4, 5, 3, 1).reshape(2, Cout, K)       # [di, co, (dj,pj,pi,c)]
    Coutp = _round_up(Cout, 8)
    wr = jnp.pad(wr, ((0, 0), (0, Coutp - Cout), (0, 0))).astype(jnp.bfloat16)
    w0, w1 = wr[0], wr[1]

    TCout, vmem_est = _pick_tcout(Coutp, K, L, HW)
    n_co = Coutp // TCout
    vmem_limit = int(min(56 * 2 ** 20, max(32 * 2 ** 20, 2 * vmem_est)))

    cost = pl.CostEstimate(
        flops=2 * N * Coutp * HW * (2 * K),
        transcendentals=N * Coutp,
        bytes_accessed=xflat.size * 2 + wr.size * 2 + N * Coutp * HW * 4,
    )

    out = pl.pallas_call(
        _make_kernel(HW, Wo, normalize),
        out_shape=jax.ShapeDtypeStruct((N, Coutp, HW), jnp.float32),
        grid_spec=pltpu.PrefetchScalarGridSpec(
            num_scalar_prefetch=0,
            grid=(N, n_co),
            in_specs=[
                # Input slab: constant block index across the Cout axis (fetched once
                # per sample, reused by every Cout block).
                pl.BlockSpec((None, K, L), lambda n, co: (n, 0, 0)),
                pl.BlockSpec((TCout, K), lambda n, co: (co, 0)),
                pl.BlockSpec((TCout, K), lambda n, co: (co, 0)),
            ],
            out_specs=pl.BlockSpec((None, TCout, HW), lambda n, co: (n, co, 0)),
        ),
        compiler_params=pltpu.CompilerParams(
            dimension_semantics=("parallel", "parallel"),
            vmem_limit_bytes=vmem_limit,
        ),
        cost_estimate=cost,
    )(xflat, w0, w1)

    # (N, Coutp, HW) -> (N, Cout, Ho, Wo): slice + reshape only, no transpose.
    return out[:, :Cout, :].reshape(N, Cout, Ho, Wo)


def _reference(x, weight):
    y = jax.lax.conv_general_dilated(
        x, weight, window_strides=(2, 2), padding=((1, 1), (1, 1)),
        dimension_numbers=("NCHW", "OIHW", "NCHW"))
    mean = y.mean(axis=(2, 3), keepdims=True)
    var = y.var(axis=(2, 3), keepdims=True)          # biased, matches InstanceNorm2d
    y = (y - mean) * jax.lax.rsqrt(var + 1e-5)
    return jnp.where(y >= 0, y, 0.2 * y)


if __name__ == "__main__":
    key = jax.random.PRNGKey(0)
    kx, kw_, kx2, kw2 = jax.random.split(key, 4)

    # Small shape consistent with the module.
    N, Cin, H, W, Cout = 2, 4, 16, 16, 8
    x = jax.random.normal(kx, (N, Cin, H, W), dtype=jnp.float32)
    bound = 1.0 / ((Cin * 16) ** 0.5)
    weight = jax.random.uniform(kw_, (Cout, Cin, 4, 4), jnp.float32, -bound, bound)

    y = unet_down(x, weight)
    jax.block_until_ready(y)
    assert y.shape == (N, Cout, H // 2, W // 2)
    err = float(jnp.max(jnp.abs(y - _reference(x, weight))))
    assert err < 1e-1, f"max abs err too large: {err}"

    # Second sanity check at a different (odd-Cin) shape through the same code path.
    N2, C2, H2, W2, Co2 = 1, 3, 32, 32, 16
    x2 = jax.random.normal(kx2, (N2, C2, H2, W2), dtype=jnp.float32)
    b2 = 1.0 / ((C2 * 16) ** 0.5)
    w2 = jax.random.uniform(kw2, (Co2, C2, 4, 4), jnp.float32, -b2, b2)
    y2 = unet_down(x2, w2)
    jax.block_until_ready(y2)
    err2 = float(jnp.max(jnp.abs(y2 - _reference(x2, w2))))
    assert err2 < 1e-1, f"max abs err too large (check 2): {err2}"

    print("KERNEL_OK")
</pallas_src>

<mosaic_0001>
module attributes {stable_mosaic.version = 11 : i64} {
  func.func @kernel(%arg0: i32, %arg1: i32, %arg2: memref<1x32x72xbf16, #tpu.memory_space<vmem>>, %arg3: memref<8x32xbf16, #tpu.memory_space<vmem>>, %arg4: memref<8x32xbf16, #tpu.memory_space<vmem>>, %arg5: memref<1x8x64xf32, #tpu.memory_space<vmem>>) attributes {dimension_semantics = [#tpu.dimension_semantics<parallel>, #tpu.dimension_semantics<parallel>], iteration_bounds = array<i64: 2, 1>, scalar_prefetch = 0 : i64, scratch_operands = 0 : i64, tpu.core_type = #tpu.core_type<tc>, window_params = [{transform_indices = @transform_0, window_bounds = array<i64: 1, 32, 72>}, {transform_indices = @transform_1, window_bounds = array<i64: 8, 32>}, {transform_indices = @transform_2, window_bounds = array<i64: 8, 32>}, {transform_indices = @transform_3, window_bounds = array<i64: 1, 8, 64>}]} {
    %c0 = arith.constant 0 : index
    %c0_0 = arith.constant 0 : index
    %c0_1 = arith.constant 0 : index
    %0 = vector.load %arg2[%c0, %c0_0, %c0_1] : memref<1x32x72xbf16, #tpu.memory_space<vmem>>, vector<1x32x64xbf16>
    %1 = vector.shape_cast %0 : vector<1x32x64xbf16> to vector<32x64xbf16>
    %c0_2 = arith.constant 0 : index
    %c0_3 = arith.constant 0 : index
    %c8 = arith.constant 8 : index
    %2 = vector.load %arg2[%c0_2, %c0_3, %c8] : memref<1x32x72xbf16, #tpu.memory_space<vmem>>, vector<1x32x64xbf16>
    %3 = vector.shape_cast %2 : vector<1x32x64xbf16> to vector<32x64xbf16>
    %c0_4 = arith.constant 0 : index
    %c0_5 = arith.constant 0 : index
    %4 = vector.load %arg3[%c0_4, %c0_5] : memref<8x32xbf16, #tpu.memory_space<vmem>>, vector<8x32xbf16>
    %cst = arith.constant dense<0.000000e+00> : vector<8x64xf32>
    %5 = tpu.matmul %4, %1, %cst {dimension_numbers = #tpu.dot_dimension_numbers<[1], [0], [0], [1], [0, 0, 1, 1], [], []>} : vector<8x32xbf16>, vector<32x64xbf16>, vector<8x64xf32> -> vector<8x64xf32>
    %c0_6 = arith.constant 0 : index
    %c0_7 = arith.constant 0 : index
    %6 = vector.load %arg4[%c0_6, %c0_7] : memref<8x32xbf16, #tpu.memory_space<vmem>>, vector<8x32xbf16>
    %cst_8 = arith.constant dense<0.000000e+00> : vector<8x64xf32>
    %7 = tpu.matmul %6, %3, %cst_8 {dimension_numbers = #tpu.dot_dimension_numbers<[1], [0], [0], [1], [0, 0, 1, 1], [], []>} : vector<8x32xbf16>, vector<32x64xbf16>, vector<8x64xf32> -> vector<8x64xf32>
    %8 = arith.addf %5, %7 : vector<8x64xf32>
    %cst_9 = arith.constant dense<0.000000e+00> : vector<8xf32>
    %9 = vector.multi_reduction <add>, %8, %cst_9 [1] : vector<8x64xf32> to vector<8xf32>
    %10 = vector.shape_cast %9 : vector<8xf32> to vector<8x1xf32>
    %cst_10 = arith.constant 1.562500e-02 : f32
    %11 = vector.broadcast %cst_10 : f32 to vector<8x1xf32>
    %12 = arith.mulf %10, %11 : vector<8x1xf32>
    %13 = vector.broadcast %12 : vector<8x1xf32> to vector<8x64xf32>
    %14 = arith.subf %8, %13 : vector<8x64xf32>
    %15 = arith.mulf %14, %14 : vector<8x64xf32>
    %cst_11 = arith.constant dense<0.000000e+00> : vector<8xf32>
    %16 = vector.multi_reduction <add>, %15, %cst_11 [1] : vector<8x64xf32> to vector<8xf32>
    %17 = vector.shape_cast %16 : vector<8xf32> to vector<8x1xf32>
    %cst_12 = arith.constant 1.562500e-02 : f32
    %18 = vector.broadcast %cst_12 : f32 to vector<8x1xf32>
    %19 = arith.mulf %17, %18 : vector<8x1xf32>
    %cst_13 = arith.constant 9.99999974E-6 : f32
    %20 = vector.broadcast %cst_13 : f32 to vector<8x1xf32>
    %21 = arith.addf %19, %20 : vector<8x1xf32>
    %22 = math.rsqrt %21 : vector<8x1xf32>
    %23 = vector.broadcast %22 : vector<8x1xf32> to vector<8x64xf32>
    %24 = arith.mulf %14, %23 : vector<8x64xf32>
    %cst_14 = arith.constant 0.000000e+00 : f32
    %25 = vector.broadcast %cst_14 : f32 to vector<8x64xf32>
    %26 = arith.cmpf oge, %24, %25 : vector<8x64xf32>
    %cst_15 = arith.constant 1.000000e+00 : f32
    %cst_16 = arith.constant 2.000000e-01 : f32
    %27 = vector.broadcast %cst_15 : f32 to vector<8x64xf32>
    %28 = vector.broadcast %cst_16 : f32 to vector<8x64xf32>
    %29 = arith.select %26, %27, %28 : vector<8x64xi1>, vector<8x64xf32>
    %30 = arith.mulf %24, %29 : vector<8x64xf32>
    %c0_17 = arith.constant 0 : index
    %c0_18 = arith.constant 0 : index
    %c0_19 = arith.constant 0 : index
    %31 = vector.load %arg5[%c0_17, %c0_18, %c0_19] : memref<1x8x64xf32, #tpu.memory_space<vmem>>, vector<1x8x64xf32>
    %32 = vector.shape_cast %31 : vector<1x8x64xf32> to vector<8x64xf32>
    %33 = vector.shape_cast %30 : vector<8x64xf32> to vector<1x8x64xf32>
    tpu.vector_store %arg5[%c0_17, %c0_18, %c0_19], %33 {strides = array<i32>} : memref<1x8x64xf32, #tpu.memory_space<vmem>>, vector<1x8x64xf32>,
    return
  }
  func.func @transform_0(%arg0: i32, %arg1: i32) -> (i32, i32, i32) {
    %c0_i32 = arith.constant 0 : i32
    %c0_i32_0 = arith.constant 0 : i32
    %c0_i32_1 = arith.constant 0 : i32
    return %arg0, %c0_i32, %c0_i32_0 : i32, i32, i32
  }
  func.func @transform_1(%arg0: i32, %arg1: i32) -> (i32, i32) {
    %c0_i32 = arith.constant 0 : i32
    %c0_i32_0 = arith.constant 0 : i32
    return %arg1, %c0_i32 : i32, i32
  }
  func.func @transform_2(%arg0: i32, %arg1: i32) -> (i32, i32) {
    %c0_i32 = arith.constant 0 : i32
    %c0_i32_0 = arith.constant 0 : i32
    return %arg1, %c0_i32 : i32, i32
  }
  func.func @transform_3(%arg0: i32, %arg1: i32) -> (i32, i32, i32) {
    %c0_i32 = arith.constant 0 : i32
    %c0_i32_0 = arith.constant 0 : i32
    return %arg0, %arg1, %c0_i32 : i32, i32, i32
  }
}

</mosaic_0001>

<bundles_post_ra>
// kernel: tpu_custom_call.1
= control target key start
LH: loop header
LB: loop body
LE: loop exit
PB: predicated region body
PF: predicated region fallthrough
CT: control target
= control target key end

     0   :  { %s1001_s0 = inlined_call_operand.hbm [shape: bf16[2,32,72], index: 0, kind: input, shape index: {}]   ;;  %s1002_s1 = inlined_call_operand.hbm [shape: bf16[8,32], index: 1, kind: input, shape index: {}]   ;;  %s1003_s2 = inlined_call_operand.hbm [shape: bf16[8,32], index: 2, kind: input, shape index: {}]   ;;  %s1004_s3 = inlined_call_operand.hbm [shape: f32[2,8,64], index: 3, kind: output, shape index: {}]  }
   0x1   :  { %1011 = sst [smem:[#allocation12_spill]] %s1002_s1 }
   0x2   :  { %8 = vsyncpa [#allocation3], 0 }
   0x3   :  { %10 = vsyncpa [#allocation3 + $0x1], 0 }
   0x4   :  { %11 = vsyncpa [#allocation6], 0 }
   0x5   :  { %12 = vsyncpa [#allocation4], 0 }
   0x6   :  { %14 = vsyncpa [#allocation4 + $0x1], 0  ;;  %s823_s12 = smov 0   ;;  %s825_s13 = smov 0  }
   0x7   :  { %s827_s14 = smov 0   ;;  %s829_s15 = smov 0  }
   0x8   :  { %s831_s16 = smov 0   ;;  %s833_s17 = smov 0  }
   0x9 LB: > { %s489_s18 = sadd.s32 4294967295, %s791_s17   ;;  %s490_s19 = sadd.s32 4294967294, %s791_s17   ;;  %s791_s17 = sphi %s833_s17, %s20_s17   ;;  %s787_s16 = sphi %s831_s16, %s1032_s16   ;;  %s783_s15 = sphi %s829_s15, %s1031_s15   ;;  %s779_s14 = sphi %s827_s14, %s1030_s14   ;;  %s775_s13 = sphi %s825_s13, %s1029_s13   ;;  %s771_s12 = sphi %s823_s12, %s1028_s12  }
   0xa   : > { %s39_s20 = sadd.s32 1, %s779_s14  ;;  %p46_p0 = scmp.ne.s32.totalorder %s779_s14, %s775_s13 }
   0xb   : > { %p47_p1 = scmp.eq.s32.totalorder %s791_s17, 0  ;;  %p52_p2 = scmp.ne.s32.totalorder %s775_s13, %s771_s12 }
   0xc   : > { %p861_p3 = scmp.eq.s32.totalorder %s489_s18, 0  ;;  %p130_p4 = scmp.eq.s32.totalorder %s489_s18, 1 }
   0xd   : > { %p865_p5 = por %p47_p1, %p46_p0  ;;  %p136_p6 = scmp.eq.s32.totalorder %s490_s19, 1 }
   0xe   : > { %s1012_s21 = scalar_select %p861_p3, 1, 0 }
   0xf   : > { %p871_p7 = por %p861_p3, %p52_p2  ;;  %p875_p8 = por %p130_p4, %p46_p0 }
  0x10   : > { %p879_p9 = por %p136_p6, %p52_p2  ;;  %p491_p10 = scmp.ge.s32.totalorder %s791_s17, 1 }
  0x11   : > { %s1014_s23 = scalar_select %p871_p7, 1, 0 }
  0x12   : > { %s1015_s24 = scalar_select %p875_p8, 1, 0 }
  0x13   : > { %s1016_s25 = scalar_select %p879_p9, 1, 0 }
  0x14   : > { %p143_p11 = scmp.lt.s32.totalorder %s791_s17, 3  ;;  %s793_s27 = smov [#allocation5]  }
  0x15   : > { %s158_s28 = sshll.u32 %s793_s27, 4  ;;  %p563_p1 = scmp.lt.s32.totalorder %s791_s17, 2  ;;  %s159_s28 = int_to_ptr.vmem [resolvable:$true] %s158_s28 }
  0x16   : > { %p886_p13 = pnand %p491_p10, %p143_p11  ;;  %s794_s30 = smov [#allocation7]  }
  0x17   : > { %p895_p4 = pnand %p563_p1, %p865_p5  ;;  %s171_s4 = sshll.u32 %s794_s30, 4  ;;  %s172_s4 = int_to_ptr.vmem [resolvable:$true] %s171_s4 }
  0x18   : > { %s1017_s26 = scalar_select %p886_p13, 1, 0 }
  0x19   : > { %p546_p0 = pneg %p886_p13  ;;  %s638_s6 = scalar_lea.vmem %s159_s28, 64 }
  0x1a   : > { %s1018_s29 = scalar_select %p895_p4, 1, 0 }
  0x1b   : > { %p901_p2 = pnand %p546_p0, %p861_p3  ;;  %p639_p10 = scmp.ne.s32.totalorder %s159_s28, %s638_s6 }
  0x1c   : > { %p646_p1 = scmp.lt.s32.totalorder %s159_s28, %s159_s28  ;;  %p647_p12 = scmp.lt.s32.totalorder %s638_s6, %s638_s6 }
  0x1d   : > { %p629_p6 = pneg %p901_p2 }
  0x1e   : > { %p648_p9 = por %p647_p12, %p646_p1 }
  0x1f   : > { %p641_p5 = pnand %p639_p10, %p629_p6 }
  0x21   : > { %p642_p11 = pneg %p641_p5 }
  0x23   : > { %p649_p8 = pnand %p648_p9, %p642_p11 }
  0x25   : > { %652 = shalt.err (!%p649_p8)
}
  0x26   : > { %s1020_s1 = sld [smem:[#allocation12_spill]]  ;;  %s664_s9 = scalar_lea.vmem %s172_s4, 64 }
  0x27   : > { %p665_p0 = scmp.ne.s32.totalorder %s172_s4, %s664_s9  ;;  %p672_p10 = scmp.lt.s32.totalorder %s172_s4, %s172_s4 }
  0x28   : > { %p673_p5 = scmp.lt.s32.totalorder %s664_s9, %s664_s9 }
  0x29   : > { %p667_p3 = pnand %p665_p0, %p629_p6 }
  0x2a   : > { %p674_p13 = por %p673_p5, %p672_p10 }
  0x2b   : > { %p668_p7 = pneg %p667_p3 }
  0x2c   : > { %549 = dma.hbm_to_vmem [thread:$0]  (!%p901_p2), %s1020_s1, 64, %s159_s28, [#allocation6]  }
  0x2d   : > { %p675_p4 = pnand %p674_p13, %p668_p7 }
  0x2f   : > { %678 = shalt.err (!%p675_p4)
}
  0x30   : > { %552 = dma.hbm_to_vmem [thread:$0]  (!%p901_p2), %s1003_s2, 64, %s172_s4, [#allocation6]  }
  0x31   : > { %s32_s18 = sadd.s32 1, %s787_s16  ;;  %s182_s19 = sand.u32 1, %s779_s14  }
  0x32   : > { %p34_p3 = scmp.ge.s32.totalorder %s32_s18, 2  ;;  %s495_s22 = sshll.u32 %s182_s19, 4 }
  0x33   : > { %s511_s27 = sshll.u32 %s787_s16, 8  ;;  %s186_s7 = scalar_lea.vmem [#allocation2], %s495_s22 }
  0x34   : > { %s1034_s18 = smov (%p34_p3, %s32_s18), 0  ;;  %s192_s5 = scalar_lea.hbm %s1001_s0, %s511_s27 }
  0x35   : > { %s36_s6 = ssub.s32 %s787_s16, %s1034_s18  ;;  %s193_s8 = sshll.u32 %s186_s7, 4  ;;  %s194_s8 = int_to_ptr.vmem [resolvable:$true] %s193_s8 }
  0x36   : > { %p37_p7 = scmp.eq.s32.totalorder %s36_s6, 0  ;;  %s183_s4 = scalar_lea.sflag [#allocation3], %s182_s19 }
  0x37   : > { %p1021_p8 = scmp.ne.s32.totalorder %s1018_s29, 0  ;;  %s692_s10 = scalar_lea.vmem %s194_s8, 256 }
  0x38   : > { %s936_s9 = scalar_select %p37_p7, %s779_s14, %s39_s20  }
  0x39   : > { %p681_p9 = pneg %p1021_p8  ;;  %p693_p12 = scmp.ne.s32.totalorder %s194_s8, %s692_s10 }
  0x3a   : > { %s795_s11 = smov [#allocation2]  }
  0x3b   : > { %p695_p13 = pnand %p693_p12, %p681_p9  ;;  %s697_s1 = sshll.u32 %s795_s11, 4  ;;  %s698_s1 = int_to_ptr.vmem [resolvable:$false] %s697_s1 }
  0x3c   : > { %s699_s28 = scalar_lea.vmem %s698_s1, 512  ;;  %p700_p2 = scmp.lt.s32.totalorder %s194_s8, %s698_s1 }
  0x3d   : > { %p696_p4 = pneg %p695_p13  ;;  %p701_p6 = scmp.lt.s32.totalorder %s699_s28, %s692_s10 }
  0x3f   : > { %p702_p11 = por %p701_p6, %p700_p2 }
  0x41   : > { %p703_p1 = pnand %p702_p11, %p696_p4 }
  0x43   : > { %706 = shalt.err (!%p703_p1)
}
  0x44   : > { %s796_s22 = smov 64   ;;  %s797_s20 = smov 4  }
  0x45   : > { %556 = dma.hbm_to_vmem [thread:$0]  (!%p1021_p8), %s192_s5, 256, %s194_s8, %s183_s4, %s796_s22, %s796_s22, %s797_s20  }
  0x46   : > { %p1022_p0 = scmp.ne.s32.totalorder %s1017_s26, 0 }
  0x47   : > { %s945_s19 = sand.u32 (!%p1022_p0), 1, %s775_s13   ;;  %p1023_p10 = scmp.ne.s32.totalorder (!%p1022_p0), %s1014_s23, 0 }
  0x48   : > { %205 = sbr.rel (%p1022_p0) target bundleno = 722 (0x2d2), region = 32  ;;  %s499_s27 = sshll.u32 (!%p1022_p0), %s945_s19, 4 }
  0x49   : > { %s208_s1 = scalar_lea.sflag (!%p1022_p0), [#allocation3], %s945_s19  ;;  %s211_s30 = scalar_lea.vmem (!%p1022_p0), [#allocation2], %s499_s27 }
  0x4d   : > { %758 = dma.done.wait (%p1023_p10), %s208_s1, 256  }
  0x4e   : > { %760 = vsyncadd (%p1023_p10), %s208_s1, 4294967040  ;;  %p1024_p5 = scmp.ne.s32.totalorder %s1012_s21, 0 }
  0x50   : > { %762 = dma.done.wait (%p1024_p5), [#allocation6], 128  }
  0x51   : > { %764 = vsyncadd (%p1024_p5), [#allocation6], 4294967168  ;;  %v798_v0 = vmov 0.0   ;;  %vm799_vm0 = vmmov 0   ;;  %v623_v1 = vld [vmem:[%s211_s30 + $0x8] sm:$0xff]   ;;  %s800_s26 = smov 120  }
  0x52   : > { %526 = vmatprep.subr.bf16.mxu1 %v798_v0  ;;  %518 = vmatprep.subr.bf16.mxu0 %v798_v0  ;;  %v624_v2 = vld [vmem:[%s211_s30] sm:$0xff]   ;;  %vm265_vm1 = vcmask 261120   ;;  %vm354_vm2 = vcmask 523264   ;;  %s502_s21 = sshll.u32 %s945_s19, 3  ;;  %s508_s23 = sshll.u32 %s783_s15, 7 }
  0x53   : > { %530 = vmatprep.mubr.msk.bf16.mxu1 %vm799_vm0, %v798_v0  ;;  %522 = vmatprep.mubr.msk.bf16.mxu0 %vm799_vm0, %v798_v0  ;;  %v247_v3 = vld [vmem:[#allocation5] sm:$0xf]  ;;  %v248_v6 = vld [vmem:[#allocation7] sm:$0xf]  ;;  %s241_s29 = scalar_lea.vmem [#allocation8], %s502_s21  ;;  %s385_s8 = scalar_lea.hbm %s1004_s3, %s508_s23 }
  0x54   : > { %261 = vrot.lane.b32.xlu0 %v623_v1, %s800_s26  ;;  %527 = vmatpush3.bf16.msra.mxu1 %v623_v1  ;;  %s387_s5 = sshll.u32 %s241_s29, 4  ;;  %v801_v27 = vmov 0.2   ;;  %s373_s4 = scalar_lea.sflag [#allocation4], %s945_s19  ;;  %s388_s5 = int_to_ptr.vmem [resolvable:$true] %s387_s5 }
  0x55   : > { %528 = vmatprep.subr.bf16.mxu1 %v798_v0  ;;  %s707_s10 = scalar_lea.vmem %s388_s5, 128  ;;  %p1025_p7 = scmp.ne.s32.totalorder %s1015_s24, 0 }
  0x56   : > { %p708_p3 = scmp.ne.s32.totalorder %s388_s5, %s707_s10  ;;  %s802_s15 = smov [#allocation8]  }
  0x57   : > { %s711_s11 = sshll.u32 %s802_s15, 4  ;;  %s712_s11 = int_to_ptr.vmem [resolvable:$false] %s711_s11 }
  0x58   : > { %259 = vrot.lane.b32.xlu0 %v624_v2, %s800_s26  ;;  %529 = vmatpush3.bf16.msra.mxu1 %v624_v2  ;;  %p709_p8 = pnand %p708_p3, %p1025_p7  ;;  %s713_s28 = scalar_lea.vmem %s712_s11, 256 }
  0x59   : > { %p714_p12 = scmp.lt.s32.totalorder %s388_s5, %s712_s11  ;;  %p715_p13 = scmp.lt.s32.totalorder %s713_s28, %s707_s10 }
  0x5a   : > { %p710_p9 = pneg %p709_p8 }
  0x5b   : > { %531 = vmatmul.mubr.msk.bf16.vlgmr.msra.gmra.mxu1 %vm265_vm1, %v247_v3  ;;  %p716_p4 = por %p715_p13, %p714_p12 }
  0x5d   : > { %p717_p2 = pnand %p716_p4, %p710_p9 }
  0xc6   : > { %v262_v4 = vpop.permute.xlu0 %261 }
  0xc7   : > { %519 = vmatpush3.bf16.msra.mxu0 %v262_v4 }
  0xc8   : > { %520 = vmatprep.subr.bf16.mxu0 %v798_v0 }
  0xca   : > { %v260_v5 = vpop.permute.xlu0 %259 }
  0xcb   : > { %521 = vmatpush3.bf16.msra.mxu0 %v260_v5 }
  0xce   : > { %523 = vmatmul.mubr.msk.bf16.vlgmr.msra.gmra.mxu0 %vm265_vm1, %v248_v6 }
 0x11b   : > { %v348_v7 = vpop.f32.mrf.mxu1 }
 0x11d   : > { %v532_v8 = vpop.f32.mrf.mxu1 }
 0x11f   : > { %v351_v9 = vpop.f32.mrf.mxu1 }
 0x121   : > { %v533_v10 = vpop.f32.mrf.mxu1 }
 0x18e   : > { %v303_v11 = vpop.f32.mrf.mxu0 }
 0x18f   : > { %v349_v12 = vadd.f32 %v348_v7, %v303_v11 }
 0x190   : > { %v524_v13 = vpop.f32.mrf.mxu0 }
 0x191   : > { %v355_v14 = vsel %vm354_vm2, %v349_v12, 0.0 }
 0x192   : > { %v306_v15 = vpop.f32.mrf.mxu0  ;;  %356 = vadd.xlane.f32.xlu1 %v355_v14 }
 0x194   : > { %v525_v16 = vpop.f32.mrf.mxu0 }
 0x21b   : > { %v357_v17 = vpop.xlane.xlu1 %356 }
 0x21c   : > { %v358_v18 = vmul.f32 0.015625, %v357_v17 }
 0x21e   : > { %v359_v19 = vsub.f32 %v349_v12, %v358_v18 }
 0x220   : > { %v360_v20 = vmul.f32 %v359_v19, %v359_v19 }
 0x222   : > { %v361_v21 = vsel %vm354_vm2, %v360_v20, 0.0 }
 0x223   : > { %362 = vadd.xlane.f32.xlu1 %v361_v21 }
 0x2ac   : > { %v363_v22 = vpop.xlane.xlu1 %362 }
 0x2ad   : > { %v364_v23 = vmul.f32 0.015625, %v363_v22 }
 0x2af   : > { %v365_v24 = vadd.f32 1e-05, %v364_v23 }
 0x2b1   : > { %625 = vrsqrt.f32 %v365_v24 }
 0x2be   : > { %v626_v25 = vpop.eup %625 }
 0x2bf   : > { %v367_v26 = vmul.f32 %v626_v25, %v359_v19 }
 0x2c1   : > { %vm368_vm3 = vcmp.ge.f32.partialorder %v367_v26, 0.0 }
 0x2c2   : > { %v369_v28 = vsel %vm368_vm3, 1.0, %v801_v27 }
 0x2c3   : > { %v370_v29 = vmul.f32 %v369_v28, %v367_v26 }
 0x2c5   : > { %371 = vst.msk [vmem:[%s241_s29] sm:$0xff] %vm354_vm2, %v370_v29 }
 0x2c6   : > { %720 = shalt.err (!%p717_p2)
}
 0x2c7   : > { %s721_s22 = scalar_lea.hbm %s385_s8, 128  ;;  %s725_s27 = scalar_lea.hbm %s1004_s3, 256 }
 0x2c8   : > { %p722_p6 = scmp.ne.s32.totalorder %s385_s8, %s721_s22  ;;  %p726_p0 = scmp.lt.s32.totalorder %s385_s8, %s1004_s3 }
 0x2c9   : > { %p727_p10 = scmp.lt.s32.totalorder %s725_s27, %s721_s22 }
 0x2ca   : > { %p723_p11 = pnand %p722_p6, %p1025_p7 }
 0x2cb   : > { %p728_p5 = por %p727_p10, %p726_p0 }
 0x2cc   : > { %p724_p1 = pneg %p723_p11 }
 0x2ce   : > { %p729_p3 = pnand %p728_p5, %p724_p1 }
 0x2d0   : > { %732 = shalt.err (!%p729_p3)
}
 0x2d1   : > { %544 = dma.vmem_to_hbm [thread:$0]  (%p1025_p7), %s388_s5, 128, %s385_s8, %s373_s4  }
 0x2d2 PF: > { %s399_s26 = sand.u32 1, %s771_s12   ;;  %p1026_p8 = scmp.ne.s32.totalorder %s1016_s25, 0 }
 0x2d3   : > { %p1027_p9 = scmp.ge.s32.totalorder %s791_s17, 2  ;;  %s400_s21 = scalar_lea.sflag [#allocation4], %s399_s26 }
 0x2d5   : > { %p558_p12 = pnand %p1027_p9, %p1026_p8 }
 0x2d7   : > { %p559_p13 = pneg %p558_p12 }
 0x2d9   : > { %766 = dma.done.wait (%p559_p13), %s400_s21, 128  }
 0x2da   : > { %768 = vsyncadd (%p559_p13), %s400_s21, 4294967168  ;;  %s20_s17 = sadd.s32 1, %s791_s17   ;;  %s1028_s12 = smov %s775_s13 }
 0x2db   : > { %p17_p4 = scmp.ge.s32.totalorder %s20_s17, 4   ;;  %s1029_s13 = smov %s779_s14 }
 0x2dc   : > { %s1030_s14 = smov %s936_s9  ;;  %s1031_s15 = smov %s787_s16 }
 0x2dd   : > { %s1032_s16 = smov %s1034_s18  ;;  %19 = sbr.rel (!%p17_p4) target bundleno = 9 (0x9), region = 87 }
 0x2e2   :  { %405 = vsyncpa [#allocation3], 1 }
 0x2e3   :  { %407 = vsyncpa [#allocation3 + $0x1], 1 }
 0x2e4   :  { %408 = vsyncpa [#allocation6], 1 }
 0x2e5   :  { %409 = vsyncpa [#allocation4], 1 }
 0x2e6   :  { %411 = vsyncpa [#allocation4 + $0x1], 1 }

</bundles_post_ra>
